<compile_context>
chip_gen: v7x
topology: tpu7x:2x2x1
jax: 0.10.0
libtpu: 0.0.40
codegen_flags: <defaults>
</compile_context>

<pallas_src>
import jax
import jax.numpy as jnp
from jax.experimental import pallas as pl
from jax.experimental.pallas import tpu as pltpu


BN_EPS = 1e-5
NORM_EPS = 1e-12
LANE = 128
MAX_TILE_B = 512                  # sized for v7x (64 MiB VMEM); fine on v5e/v6e
VMEM_LIMIT = 32 * 1024 * 1024


def _round_up(n, m):
    return ((n + m - 1) // m) * m


def _sigmoid(z):
    return 1.0 / (1.0 + jnp.exp(-z))


def learn_summaries(x, w_ih, b_ih, b_hh, bn_gamma, bn_beta, lin_w, lin_b):
    """Forward pass of LearnSummaries.

    x:      (B, wikiDim) float32
    w_ih:   (4*embDim, wikiDim)   PyTorch LSTM weight_ih_l0 (gate order i,f,g,o)
    b_ih:   (4*embDim,)           bias_ih_l0
    b_hh:   (4*embDim,)           bias_hh_l0   (weight_hh_l0 is dead: seq_len==1, h0=0)
    bn_*:   (embDim,)             BatchNorm1d gamma / beta
    lin_w:  (embDim, embDim)      Linear weight, lin_b: (embDim,)
    returns (B, embDim) float32
    """
    B, wiki = x.shape
    emb = lin_w.shape[0]
    Dw = _round_up(wiki, LANE)
    De = _round_up(emb, LANE)

    # ---- parameter preparation (lane-dense, pre-transposed) -----------------
    w4 = w_ih.reshape(4, emb, wiki).astype(jnp.float32)
    b4 = (b_ih + b_hh).reshape(4, emb).astype(jnp.float32)
    # keep only i, g, o gates (forget gate is dead because c_0 == 0)
    w_igo = jnp.stack([w4[0], w4[2], w4[3]], axis=0)          # (3, emb, wiki)
    b_igo = jnp.stack([b4[0], b4[2], b4[3]], axis=0)          # (3, emb)
    w_igo = jnp.pad(w_igo, ((0, 0), (0, De - emb), (0, Dw - wiki)))
    b_igo = jnp.pad(b_igo, ((0, 0), (0, De - emb)))
    wih_t = jnp.transpose(w_igo, (2, 0, 1)).reshape(Dw, 3 * De)  # (Dw, 3*De)
    b_row = b_igo.reshape(1, 3 * De)

    lwt_p = jnp.pad(jnp.transpose(lin_w).astype(jnp.float32),
                    ((0, De - emb), (0, De - emb)))              # (De, De)
    lb_p = jnp.pad(lin_b.astype(jnp.float32), (0, De - emb)).reshape(1, De)
    gamma_p = jnp.pad(bn_gamma.astype(jnp.float32), (0, De - emb)).reshape(1, De)
    beta_p = jnp.pad(bn_beta.astype(jnp.float32), (0, De - emb)).reshape(1, De)
    x_p = jnp.pad(x.astype(jnp.float32), ((0, 0), (0, Dw - wiki)))  # (B, Dw)

    # ---- batch tiling --------------------------------------------------------
    if B % MAX_TILE_B == 0:
        tile_b = MAX_TILE_B
    else:
        tile_b = B              # single full-batch tile (full-dim block is legal)
    nb = B // tile_b
    inv_b = 1.0 / float(B)

    # ---- pass 1: LSTM single step + ReLU, accumulate batch statistics -------
    def pass1_kernel(x_ref, wih_ref, b_ref, h_ref, sum_ref, ssq_ref):
        gates = jnp.dot(x_ref[...], wih_ref[...],
                        preferred_element_type=jnp.float32) + b_ref[...]
        i_g = _sigmoid(gates[:, 0:De])
        g_g = jnp.tanh(gates[:, De:2 * De])
        o_g = _sigmoid(gates[:, 2 * De:3 * De])
        h = jnp.maximum(o_g * jnp.tanh(i_g * g_g), 0.0)         # ReLU(LSTM out)
        h_ref[...] = h

        @pl.when(pl.program_id(0) == 0)
        def _init():
            sum_ref[...] = jnp.zeros_like(sum_ref)
            ssq_ref[...] = jnp.zeros_like(ssq_ref)

        sum_ref[...] += jnp.sum(h, axis=0, keepdims=True)
        ssq_ref[...] += jnp.sum(h * h, axis=0, keepdims=True)

    h_pad, h_sum, h_ssq = pl.pallas_call(
        pass1_kernel,
        out_shape=(jax.ShapeDtypeStruct((B, De), jnp.float32),
                   jax.ShapeDtypeStruct((1, De), jnp.float32),
                   jax.ShapeDtypeStruct((1, De), jnp.float32)),
        grid_spec=pltpu.PrefetchScalarGridSpec(
            num_scalar_prefetch=0,
            grid=(nb,),
            in_specs=[pl.BlockSpec((tile_b, Dw), lambda i: (i, 0)),
                      pl.BlockSpec((Dw, 3 * De), lambda i: (0, 0)),
                      pl.BlockSpec((1, 3 * De), lambda i: (0, 0))],
            out_specs=(pl.BlockSpec((tile_b, De), lambda i: (i, 0)),
                       pl.BlockSpec((1, De), lambda i: (0, 0)),
                       pl.BlockSpec((1, De), lambda i: (0, 0)))),
        compiler_params=pltpu.CompilerParams(
            dimension_semantics=("arbitrary",),      # stats accumulation is sequential
            vmem_limit_bytes=VMEM_LIMIT),
    )(x_p, wih_t, b_row)

    # ---- pass 2: BatchNorm (batch stats) + Linear + Tanh + L2 norm ----------
    def pass2_kernel(h_ref, sum_ref, ssq_ref, gamma_ref, beta_ref,
                     lwt_ref, lb_ref, o_ref):
        mean = sum_ref[...] * inv_b
        var = jnp.maximum(ssq_ref[...] * inv_b - mean * mean, 0.0)
        scale = jax.lax.rsqrt(var + BN_EPS) * gamma_ref[...]
        shift = beta_ref[...] - mean * scale
        hn = h_ref[...] * scale + shift
        y = jnp.dot(hn, lwt_ref[...],
                    preferred_element_type=jnp.float32) + lb_ref[...]
        y = jnp.tanh(y)
        # L2-normalize: rsqrt + multiply; clamp(norm, eps) == rsqrt(max(sumsq, eps^2))
        inv_n = jax.lax.rsqrt(jnp.maximum(jnp.sum(y * y, axis=1, keepdims=True),
                                          NORM_EPS * NORM_EPS))
        o_ref[...] = (y * inv_n).astype(o_ref.dtype)

    out_pad = pl.pallas_call(
        pass2_kernel,
        out_shape=jax.ShapeDtypeStruct((B, De), jnp.float32),
        grid_spec=pltpu.PrefetchScalarGridSpec(
            num_scalar_prefetch=0,
            grid=(nb,),
            in_specs=[pl.BlockSpec((tile_b, De), lambda i: (i, 0)),
                      pl.BlockSpec((1, De), lambda i: (0, 0)),
                      pl.BlockSpec((1, De), lambda i: (0, 0)),
                      pl.BlockSpec((1, De), lambda i: (0, 0)),
                      pl.BlockSpec((1, De), lambda i: (0, 0)),
                      pl.BlockSpec((De, De), lambda i: (0, 0)),
                      pl.BlockSpec((1, De), lambda i: (0, 0))],
            out_specs=pl.BlockSpec((tile_b, De), lambda i: (i, 0))),
        compiler_params=pltpu.CompilerParams(
            dimension_semantics=("parallel",),       # independent batch tiles
            vmem_limit_bytes=VMEM_LIMIT),
    )(h_pad, h_sum, h_ssq, gamma_p, beta_p, lwt_p, lb_p)

    return out_pad[:, :emb]


# ---- pure-JAX reference (PyTorch semantics) ---------------------------------
def reference(x, w_ih, b_ih, b_hh, bn_gamma, bn_beta, lin_w, lin_b):
    emb = lin_w.shape[0]
    gates = x @ w_ih.T + b_ih + b_hh                  # (B, 4*emb), order i,f,g,o
    i = _sigmoid(gates[:, 0:emb])
    g = jnp.tanh(gates[:, 2 * emb:3 * emb])
    o = _sigmoid(gates[:, 3 * emb:4 * emb])
    h = o * jnp.tanh(i * g)                           # h0 = c0 = 0  =>  c1 = i*g
    h = jnp.maximum(h, 0.0)
    mean = jnp.mean(h, axis=0, keepdims=True)
    var = jnp.mean((h - mean) ** 2, axis=0, keepdims=True)
    h = (h - mean) / jnp.sqrt(var + BN_EPS) * bn_gamma + bn_beta
    y = jnp.tanh(h @ lin_w.T + lin_b)
    n = jnp.maximum(jnp.linalg.norm(y, axis=1, keepdims=True), NORM_EPS)
    return y / n


if __name__ == "__main__":
    B, WIKI_DIM, EMB_DIM = 8, 16, 32   # small shapes consistent with the module

    key = jax.random.PRNGKey(0)
    kx, kw, kbi, kbh, kg, kb2, klw, klb = jax.random.split(key, 8)

    x = jax.random.normal(kx, (B, WIKI_DIM), dtype=jnp.float32)
    w_ih = jax.random.normal(kw, (4 * EMB_DIM, WIKI_DIM), dtype=jnp.float32) * 0.2
    b_ih = jax.random.normal(kbi, (4 * EMB_DIM,), dtype=jnp.float32) * 0.1
    b_hh = jax.random.normal(kbh, (4 * EMB_DIM,), dtype=jnp.float32) * 0.1
    # weight_hh_l0 is omitted: with seq_len == 1 and h_0 = 0 it never contributes.
    bn_gamma = 1.0 + 0.05 * jax.random.normal(kg, (EMB_DIM,), dtype=jnp.float32)
    bn_beta = 0.05 * jax.random.normal(kb2, (EMB_DIM,), dtype=jnp.float32)
    lin_w = jax.random.normal(klw, (EMB_DIM, EMB_DIM), dtype=jnp.float32) * 0.2
    lin_b = jax.random.normal(klb, (EMB_DIM,), dtype=jnp.float32) * 0.1

    out = learn_summaries(x, w_ih, b_ih, b_hh, bn_gamma, bn_beta, lin_w, lin_b)
    out = jax.block_until_ready(out)

    ref = reference(x, w_ih, b_ih, b_hh, bn_gamma, bn_beta, lin_w, lin_b)
    assert out.shape == (B, EMB_DIM)
    err = float(jnp.max(jnp.abs(out - ref)))
    assert jnp.allclose(out, ref, atol=1e-4, rtol=1e-4), err

    print("KERNEL_OK")
</pallas_src>

<mosaic_0001>
module attributes {stable_mosaic.version = 11 : i64} {
  func.func @pass1_kernel(%arg0: i32, %arg1: memref<8x128xf32, #tpu.memory_space<vmem>>, %arg2: memref<128x384xf32, #tpu.memory_space<vmem>>, %arg3: memref<1x384xf32, #tpu.memory_space<vmem>>, %arg4: memref<8x128xf32, #tpu.memory_space<vmem>>, %arg5: memref<1x128xf32, #tpu.memory_space<vmem>>, %arg6: memref<1x128xf32, #tpu.memory_space<vmem>>) attributes {dimension_semantics = [#tpu.dimension_semantics<arbitrary>], iteration_bounds = array<i64: 1>, scalar_prefetch = 0 : i64, scratch_operands = 0 : i64, tpu.core_type = #tpu.core_type<tc>, window_params = [{transform_indices = @transform_0, window_bounds = array<i64: 8, 128>}, {pipeline_mode = #tpu.pipeline_mode<synchronous>, transform_indices = @transform_1, window_bounds = array<i64: 128, 384>}, {pipeline_mode = #tpu.pipeline_mode<synchronous>, transform_indices = @transform_2, window_bounds = array<i64: 1, 384>}, {transform_indices = @transform_3, window_bounds = array<i64: 8, 128>}, {pipeline_mode = #tpu.pipeline_mode<synchronous>, transform_indices = @transform_4, window_bounds = array<i64: 1, 128>}, {pipeline_mode = #tpu.pipeline_mode<synchronous>, transform_indices = @transform_5, window_bounds = array<i64: 1, 128>}]} {
    %c0 = arith.constant 0 : index
    %c0_0 = arith.constant 0 : index
    %0 = vector.load %arg1[%c0, %c0_0] : memref<8x128xf32, #tpu.memory_space<vmem>>, vector<8x128xf32>
    %c0_1 = arith.constant 0 : index
    %c0_2 = arith.constant 0 : index
    %1 = vector.load %arg2[%c0_1, %c0_2] : memref<128x384xf32, #tpu.memory_space<vmem>>, vector<128x384xf32>
    %cst = arith.constant dense<0.000000e+00> : vector<8x384xf32>
    %2 = tpu.matmul %0, %1, %cst {dimension_numbers = #tpu.dot_dimension_numbers<[1], [0], [0], [1], [0, 0, 1, 1], [], []>} : vector<8x128xf32>, vector<128x384xf32>, vector<8x384xf32> -> vector<8x384xf32>
    %c0_3 = arith.constant 0 : index
    %c0_4 = arith.constant 0 : index
    %3 = vector.load %arg3[%c0_3, %c0_4] : memref<1x384xf32, #tpu.memory_space<vmem>>, vector<1x384xf32>
    %4 = vector.broadcast %3 : vector<1x384xf32> to vector<8x384xf32>
    %5 = arith.addf %2, %4 : vector<8x384xf32>
    %6 = vector.extract_strided_slice %5 {offsets = [0, 0], sizes = [8, 128], strides = [1, 1]} : vector<8x384xf32> to vector<8x128xf32>
    %cst_5 = arith.constant 0.000000e+00 : f32
    %7 = vector.broadcast %cst_5 : f32 to vector<8x128xf32>
    %8 = arith.subf %7, %6 : vector<8x128xf32>
    %9 = math.exp %8 : vector<8x128xf32>
    %cst_6 = arith.constant 1.000000e+00 : f32
    %10 = vector.broadcast %cst_6 : f32 to vector<8x128xf32>
    %11 = arith.addf %10, %9 : vector<8x128xf32>
    %cst_7 = arith.constant 1.000000e+00 : f32
    %12 = vector.broadcast %cst_7 : f32 to vector<8x128xf32>
    %13 = arith.divf %12, %11 : vector<8x128xf32>
    %14 = vector.extract_strided_slice %5 {offsets = [0, 128], sizes = [8, 128], strides = [1, 1]} : vector<8x384xf32> to vector<8x128xf32>
    %15 = math.tanh %14 : vector<8x128xf32>
    %16 = vector.extract_strided_slice %5 {offsets = [0, 256], sizes = [8, 128], strides = [1, 1]} : vector<8x384xf32> to vector<8x128xf32>
    %cst_8 = arith.constant 0.000000e+00 : f32
    %17 = vector.broadcast %cst_8 : f32 to vector<8x128xf32>
    %18 = arith.subf %17, %16 : vector<8x128xf32>
    %19 = math.exp %18 : vector<8x128xf32>
    %cst_9 = arith.constant 1.000000e+00 : f32
    %20 = vector.broadcast %cst_9 : f32 to vector<8x128xf32>
    %21 = arith.addf %20, %19 : vector<8x128xf32>
    %cst_10 = arith.constant 1.000000e+00 : f32
    %22 = vector.broadcast %cst_10 : f32 to vector<8x128xf32>
    %23 = arith.divf %22, %21 : vector<8x128xf32>
    %24 = arith.mulf %13, %15 : vector<8x128xf32>
    %25 = math.tanh %24 : vector<8x128xf32>
    %26 = arith.mulf %23, %25 : vector<8x128xf32>
    %cst_11 = arith.constant 0.000000e+00 : f32
    %27 = vector.broadcast %cst_11 : f32 to vector<8x128xf32>
    %28 = arith.maximumf %26, %27 : vector<8x128xf32>
    %c0_12 = arith.constant 0 : index
    %c0_13 = arith.constant 0 : index
    %29 = vector.load %arg4[%c0_12, %c0_13] : memref<8x128xf32, #tpu.memory_space<vmem>>, vector<8x128xf32>
    tpu.vector_store %arg4[%c0_12, %c0_13], %28 {strides = array<i32>} : memref<8x128xf32, #tpu.memory_space<vmem>>, vector<8x128xf32>,
    %c0_i32 = arith.constant 0 : i32
    %30 = arith.cmpi eq, %arg0, %c0_i32 : i32
    %31 = arith.extui %30 : i1 to i32
    %c0_i32_14 = arith.constant 0 : i32
    %32 = arith.cmpi ne, %31, %c0_i32_14 : i32
    scf.if %32 {
      %cst_25 = arith.constant 0.000000e+00 : f32
      %44 = vector.broadcast %cst_25 : f32 to vector<1x128xf32>
      %c0_26 = arith.constant 0 : index
      %c0_27 = arith.constant 0 : index
      %45 = vector.load %arg5[%c0_26, %c0_27] : memref<1x128xf32, #tpu.memory_space<vmem>>, vector<1x128xf32>
      tpu.vector_store %arg5[%c0_26, %c0_27], %44 {strides = array<i32>} : memref<1x128xf32, #tpu.memory_space<vmem>>, vector<1x128xf32>,
      %cst_28 = arith.constant 0.000000e+00 : f32
      %46 = vector.broadcast %cst_28 : f32 to vector<1x128xf32>
      %c0_29 = arith.constant 0 : index
      %c0_30 = arith.constant 0 : index
      %47 = vector.load %arg6[%c0_29, %c0_30] : memref<1x128xf32, #tpu.memory_space<vmem>>, vector<1x128xf32>
      tpu.vector_store %arg6[%c0_29, %c0_30], %46 {strides = array<i32>} : memref<1x128xf32, #tpu.memory_space<vmem>>, vector<1x128xf32>,
    } else {
    }
    %c0_15 = arith.constant 0 : index
    %c0_16 = arith.constant 0 : index
    %33 = vector.load %arg5[%c0_15, %c0_16] : memref<1x128xf32, #tpu.memory_space<vmem>>, vector<1x128xf32>
    %cst_17 = arith.constant dense<0.000000e+00> : vector<128xf32>
    %34 = vector.multi_reduction <add>, %28, %cst_17 [0] : vector<8x128xf32> to vector<128xf32>
    %35 = vector.shape_cast %34 : vector<128xf32> to vector<1x128xf32>
    %36 = arith.addf %33, %35 : vector<1x128xf32>
    %c0_18 = arith.constant 0 : index
    %c0_19 = arith.constant 0 : index
    %37 = vector.load %arg5[%c0_18, %c0_19] : memref<1x128xf32, #tpu.memory_space<vmem>>, vector<1x128xf32>
    tpu.vector_store %arg5[%c0_18, %c0_19], %36 {strides = array<i32>} : memref<1x128xf32, #tpu.memory_space<vmem>>, vector<1x128xf32>,
    %c0_20 = arith.constant 0 : index
    %c0_21 = arith.constant 0 : index
    %38 = vector.load %arg6[%c0_20, %c0_21] : memref<1x128xf32, #tpu.memory_space<vmem>>, vector<1x128xf32>
    %39 = arith.mulf %28, %28 : vector<8x128xf32>
    %cst_22 = arith.constant dense<0.000000e+00> : vector<128xf32>
    %40 = vector.multi_reduction <add>, %39, %cst_22 [0] : vector<8x128xf32> to vector<128xf32>
    %41 = vector.shape_cast %40 : vector<128xf32> to vector<1x128xf32>
    %42 = arith.addf %38, %41 : vector<1x128xf32>
    %c0_23 = arith.constant 0 : index
    %c0_24 = arith.constant 0 : index
    %43 = vector.load %arg6[%c0_23, %c0_24] : memref<1x128xf32, #tpu.memory_space<vmem>>, vector<1x128xf32>
    tpu.vector_store %arg6[%c0_23, %c0_24], %42 {strides = array<i32>} : memref<1x128xf32, #tpu.memory_space<vmem>>, vector<1x128xf32>,
    return
  }
  func.func @transform_0(%arg0: i32) -> (i32, i32) {
    %c0_i32 = arith.constant 0 : i32
    %c0_i32_0 = arith.constant 0 : i32
    return %arg0, %c0_i32 : i32, i32
  }
  func.func @transform_1(%arg0: i32) -> (i32, i32) {
    %c0_i32 = arith.constant 0 : i32
    %c0_i32_0 = arith.constant 0 : i32
    %c0_i32_1 = arith.constant 0 : i32
    return %c0_i32, %c0_i32_0 : i32, i32
  }
  func.func @transform_2(%arg0: i32) -> (i32, i32) {
    %c0_i32 = arith.constant 0 : i32
    %c0_i32_0 = arith.constant 0 : i32
    %c0_i32_1 = arith.constant 0 : i32
    return %c0_i32, %c0_i32_0 : i32, i32
  }
  func.func @transform_3(%arg0: i32) -> (i32, i32) {
    %c0_i32 = arith.constant 0 : i32
    %c0_i32_0 = arith.constant 0 : i32
    return %arg0, %c0_i32 : i32, i32
  }
  func.func @transform_4(%arg0: i32) -> (i32, i32) {
    %c0_i32 = arith.constant 0 : i32
    %c0_i32_0 = arith.constant 0 : i32
    %c0_i32_1 = arith.constant 0 : i32
    return %c0_i32, %c0_i32_0 : i32, i32
  }
  func.func @transform_5(%arg0: i32) -> (i32, i32) {
    %c0_i32 = arith.constant 0 : i32
    %c0_i32_0 = arith.constant 0 : i32
    %c0_i32_1 = arith.constant 0 : i32
    return %c0_i32, %c0_i32_0 : i32, i32
  }
}

</mosaic_0001>

<bundles_post_ra>
// kernel: tpu_custom_call.1
= control target key start
LH: loop header
LB: loop body
LE: loop exit
PB: predicated region body
PF: predicated region fallthrough
CT: control target
= control target key end

     0   :  { %11 = vsyncpa [#allocation3], 0  ;;  %s712_s0 = inlined_call_operand.hbm [shape: f32[8,128], index: 0, kind: input, shape index: {}]   ;;  %s713_s1 = inlined_call_operand.hbm [shape: f32[128,384], index: 1, kind: input, shape index: {}]   ;;  %s714_s2 = inlined_call_operand.vmem [shape: f32[1,384], index: 2, kind: input, shape index: {}]   ;;  %s715_s3 = inlined_call_operand.hbm [shape: f32[8,128], index: 3, kind: output, shape index: {0}]   ;;  %s716_s4 = inlined_call_operand.hbm [shape: f32[1,128], index: 4, kind: output, shape index: {1}]   ;;  %s717_s5 = inlined_call_operand.hbm [shape: f32[1,128], index: 5, kind: output, shape index: {2}]  }
   0x1   :  { %12 = vsyncpa [#allocation6], 0 }
   0x2   :  { %13 = vsyncpa [#allocation4], 0 }
   0x3   :  { %14 = vsyncpa [#allocation9], 0  ;;  %s586_s18 = smov [#allocation2]   ;;  %s587_s20 = smov [#allocation5]  }
   0x4   :  { %s21_s19 = sshll.u32 %s586_s18, 4  ;;  %s30_s21 = sshll.u32 %s587_s20, 4  ;;  %s22_s19 = int_to_ptr.vmem [resolvable:$true] %s21_s19  ;;  %s626_s21 = int_to_ptr.vmem [resolvable:$true] %s30_s21 }
   0x5   :  { %s468_s24 = scalar_lea.hbm %s712_s0, 128 }
   0x6   :  { %p469_p0 = scmp.ne.s32.totalorder %s712_s0, %s468_s24  ;;  %p472_p1 = scmp.lt.u32.totalorder %s468_s24, %s712_s0 }
   0x8   :  { %p474_p2 = pnand %p472_p1, %p469_p0 }
   0xa   :  { %477 = shalt.err (!%p474_p2)
}
   0xb   :  { %s478_s29 = scalar_lea.vmem %s22_s19, 128  ;;  %p483_p4 = scmp.lt.s32.totalorder %s22_s19, %s22_s19 }
   0xc   :  { %p479_p3 = scmp.ne.s32.totalorder %s22_s19, %s478_s29  ;;  %p484_p5 = scmp.lt.s32.totalorder %s478_s29, %s478_s29 }
   0xe   :  { %p485_p6 = por %p484_p5, %p483_p4 }
  0x10   :  { %p486_p7 = pnand %p485_p6, %p479_p3 }
  0x12   :  { %489 = shalt.err (!%p486_p7)
}
  0x13   :  { %24 = dma.hbm_to_vmem [thread:$0]  %s712_s0, 128, %s22_s19, [#allocation3]  }
  0x14   :  { %s490_s9 = scalar_lea.hbm %s713_s1, 6144 }
  0x15   :  { %p491_p8 = scmp.ne.s32.totalorder %s713_s1, %s490_s9  ;;  %p494_p9 = scmp.lt.u32.totalorder %s490_s9, %s713_s1 }
  0x17   :  { %p496_p10 = pnand %p494_p9, %p491_p8 }
  0x19   :  { %499 = shalt.err (!%p496_p10)
}
  0x1a   :  { %s500_s14 = scalar_lea.vmem %s626_s21, 6144  ;;  %p505_p12 = scmp.lt.s32.totalorder %s626_s21, %s626_s21 }
  0x1b   :  { %p501_p11 = scmp.ne.s32.totalorder %s626_s21, %s500_s14  ;;  %p506_p13 = scmp.lt.s32.totalorder %s500_s14, %s500_s14 }
  0x1d   :  { %p507_p0 = por %p506_p13, %p505_p12 }
  0x1f   :  { %p508_p1 = pnand %p507_p0, %p501_p11 }
  0x21   :  { %511 = shalt.err (!%p508_p1)
}
  0x22   :  { %s588_s0 = smov 384   ;;  %s589_s15 = smov 24  }
  0x23   :  { %36 = dma.hbm_to_vmem [thread:$0]  %s713_s1, 6144, %s626_s21, [#allocation6], %s588_s0, %s588_s0, %s589_s15  }
  0x24   :  { %578 = dma.done.wait [#allocation3], 128  }
  0x25   :  { %579 = vsyncadd [#allocation3], 4294967168 }
  0x26   :  { %580 = dma.done.wait [#allocation6], 6144  }
  0x27   :  { %581 = vsyncadd [#allocation6], 4294961152  ;;  %v590_v0 = vmov 0.0|0.0   ;;  %v591_v1 = vmov 0.0   ;;  %vm592_vm0 = vmmov 0   ;;  %v47_v2 = vld [vmem:[#allocation5 + $0x8] sm:$0xff] }
  0x28   :  { %422 = vmatprep.subr.bf16.mxu1 %v590_v0  ;;  %175 = vmatprep.mubr.f32.mxu0 %v591_v1  ;;  %274 = vst [vmem:[#allocation8] sm:$0x1] %v591_v1  ;;  %275 = vst [vmem:[#allocation10] sm:$0x1] %v591_v1  ;;  %v50_v3 = vld [vmem:[#allocation5 + $0x20] sm:$0xff]  ;;  %v49_v6 = vld [vmem:[#allocation5 + $0x18] sm:$0xff] }
  0x29   :  { %387 = vmatprep.mubr.msk.f32.mxu1 %vm592_vm0, %v591_v1  ;;  %v46_v4 = vld [vmem:[#allocation5] sm:$0xff]  ;;  %v390_v5 = vpack.c.bf16 %v50_v3, %v47_v2  ;;  %v53_v7 = vld [vmem:[#allocation5 + $0x38] sm:$0xff]  ;;  %v56_v8 = vld [vmem:[#allocation5 + $0x50] sm:$0xff] }
  0x2a   :  { %v392_v9 = vpack.c.bf16 %v49_v6, %v46_v4  ;;  %v394_v10 = vpack.c.bf16 %v56_v8, %v53_v7  ;;  %v52_v11 = vld [vmem:[#allocation5 + $0x30] sm:$0xff]  ;;  %v55_v12 = vld [vmem:[#allocation5 + $0x48] sm:$0xff]  ;;  %v62_v14 = vld [vmem:[#allocation5 + $0x80] sm:$0xff] }
  0x2b   :  { %v59_v13 = vld [vmem:[#allocation5 + $0x68] sm:$0xff]  ;;  %391 = vmatprep.subr.bf16.mxu0 %v390_v5  ;;  %v396_v15 = vpack.c.bf16 %v55_v12, %v52_v11  ;;  %v58_v16 = vld [vmem:[#allocation5 + $0x60] sm:$0xff]  ;;  %v61_v18 = vld [vmem:[#allocation5 + $0x78] sm:$0xff]  ;;  %v96_v12 = vlaneseq }
  0x2c   :  { %393 = vmatpush1.bf16.msra.mxu0 %v392_v9  ;;  %v398_v17 = vpack.c.bf16 %v62_v14, %v59_v13  ;;  %v48_v19 = vld [vmem:[#allocation5 + $0x10] sm:$0xff]  ;;  %v51_v20 = vld [vmem:[#allocation5 + $0x28] sm:$0xff]  ;;  %v65_v21 = vld [vmem:[#allocation5 + $0x98] sm:$0xff]  ;;  %v400_v26 = vpack.c.bf16 %v61_v18, %v58_v16 }
  0x2d   :  { %395 = vmatprep.subr.bf16.mxu0 %v394_v10  ;;  %v68_v22 = vld [vmem:[#allocation5 + $0xb0] sm:$0xff]  ;;  %v423_v23 = vpack.c.bf16 %v51_v20, %v48_v19  ;;  %v54_v24 = vld [vmem:[#allocation5 + $0x40] sm:$0xff]  ;;  %v57_v25 = vld [vmem:[#allocation5 + $0x58] sm:$0xff]  ;;  %v97_v13 = vshrl.u32 %v96_v12, 7 }
  0x2e   :  { %v64_v27 = vld [vmem:[#allocation5 + $0x90] sm:$0xff]  ;;  %v426_v28 = vpack.c.bf16 %v57_v25, %v54_v24  ;;  %v402_v29 = vpack.c.bf16 %v68_v22, %v65_v21  ;;  %v67_v30 = vld [vmem:[#allocation5 + $0xa8] sm:$0xff]  ;;  %v74_v34 = vld [vmem:[#allocation5 + $0xe0] sm:$0xff] }
  0x2f   :  { %424 = vmatpush3.bf16.msra.mxu1 %v423_v23  ;;  %v60_v31 = vld [vmem:[#allocation5 + $0x70] sm:$0xff]  ;;  %v63_v32 = vld [vmem:[#allocation5 + $0x88] sm:$0xff]  ;;  %v404_v35 = vpack.c.bf16 %v67_v30, %v64_v27  ;;  %v70_v36 = vld [vmem:[#allocation5 + $0xc0] sm:$0xff]  ;;  %v98_v14 = vsub.s32 0, %v97_v13 }
  0x30   :  { %397 = vmatpush1.bf16.msra.mxu0 %v396_v15  ;;  %425 = vmatprep.subr.bf16.mxu1 %v590_v0  ;;  %v71_v33 = vld [vmem:[#allocation5 + $0xc8] sm:$0xff]  ;;  %v429_v37 = vpack.c.bf16 %v63_v32, %v60_v31  ;;  %v73_v39 = vld [vmem:[#allocation5 + $0xd8] sm:$0xff]  ;;  %v66_v40 = vld [vmem:[#allocation5 + $0xa0] sm:$0xff] }
  0x31   :  { %399 = vmatprep.subr.bf16.mxu0 %v398_v17  ;;  %v406_v38 = vpack.c.bf16 %v74_v34, %v71_v33  ;;  %v69_v41 = vld [vmem:[#allocation5 + $0xb8] sm:$0xff]  ;;  %v80_v43 = vld [vmem:[#allocation5 + $0x110] sm:$0xff]  ;;  %v408_v44 = vpack.c.bf16 %v73_v39, %v70_v36  ;;  %v79_v48 = vld [vmem:[#allocation5 + $0x108] sm:$0xff]  ;;  %v106_v17 = vsub.s32 2, %v97_v13 }
  0x32   :  { %v77_v42 = vld [vmem:[#allocation5 + $0xf8] sm:$0xff]  ;;  %v76_v45 = vld [vmem:[#allocation5 + $0xf0] sm:$0xff]  ;;  %v432_v46 = vpack.c.bf16 %v69_v41, %v66_v40  ;;  %v75_v50 = vld [vmem:[#allocation5 + $0xe8] sm:$0xff] }
  0x33   :  { %427 = vmatpush3.bf16.msra.mxu1 %v426_v28  ;;  %v410_v47 = vpack.c.bf16 %v80_v43, %v77_v42  ;;  %v72_v49 = vld [vmem:[#allocation5 + $0xd0] sm:$0xff]  ;;  %v83_v51 = vld [vmem:[#allocation5 + $0x128] sm:$0xff]  ;;  %v86_v52 = vld [vmem:[#allocation5 + $0x140] sm:$0xff]  ;;  %v412_v53 = vpack.c.bf16 %v79_v48, %v76_v45 }
  0x34   :  { %401 = vmatpush1.bf16.msra.mxu0 %v400_v26  ;;  %428 = vmatprep.subr.bf16.mxu1 %v590_v0  ;;  %v82_v54 = vld [vmem:[#allocation5 + $0x120] sm:$0xff]  ;;  %v435_v55 = vpack.c.bf16 %v75_v50, %v72_v49  ;;  %v414_v56 = vpack.c.bf16 %v86_v52, %v83_v51  ;;  %v85_v57 = vld [vmem:[#allocation5 + $0x138] sm:$0xff]  ;;  %v92_v61 = vld [vmem:[#allocation5 + $0x170] sm:$0xff]  ;;  %v102_v26 = vsub.s32 1, %v97_v13 }
  0x35   :  { %403 = vmatprep.subr.bf16.mxu0 %v402_v29  ;;  %v78_v58 = vld [vmem:[#allocation5 + $0x100] sm:$0xff]  ;;  %v81_v59 = vld [vmem:[#allocation5 + $0x118] sm:$0xff]  ;;  %v416_v62 = vpack.c.bf16 %v85_v57, %v82_v54  ;;  %v88_v63 = vld [vmem:[#allocation5 + $0x150] sm:$0xff] }
  0x36   :  { %v89_v60 = vld [vmem:[#allocation5 + $0x158] sm:$0xff]  ;;  %v438_v1 = vpack.c.bf16 %v81_v59, %v78_v58  ;;  %v91_v3 = vld [vmem:[#allocation5 + $0x168] sm:$0xff]  ;;  %v84_v4 = vld [vmem:[#allocation5 + $0x130] sm:$0xff] }
  0x37   :  { %430 = vmatpush3.bf16.msra.mxu1 %v429_v37  ;;  %v418_v2 = vpack.c.bf16 %v92_v61, %v89_v60  ;;  %v87_v5 = vld [vmem:[#allocation5 + $0x148] sm:$0xff]  ;;  %v420_v6 = vpack.c.bf16 %v91_v3, %v88_v63  ;;  %v90_v8 = vld [vmem:[#allocation5 + $0x160] sm:$0xff]  ;;  %v93_v9 = vld [vmem:[#allocation5 + $0x178] sm:$0xff] }
  0x38   :  { %405 = vmatpush1.bf16.msra.mxu0 %v404_v35  ;;  %431 = vmatprep.subr.bf16.mxu1 %v590_v0  ;;  %v441_v7 = vpack.c.bf16 %v87_v5, %v84_v4  ;;  %v45_v10 = vld [vmem:[#allocation2] sm:$0xff]  ;;  %v444_v11 = vpack.c.bf16 %v93_v9, %v90_v8 }
  0x39   :  { %407 = vmatprep.subr.bf16.mxu0 %v406_v38  ;;  %v94_v15 = vld [vmem:[%s714_s2] sm:$0x7]  ;;  %s593_s2 = smov [#allocation7]  }
  0x3a   :  { %v99_v16 = vrot.slane %v94_v15, %v98_v14  ;;  %v107_v21 = vrot.slane %v94_v15, %v106_v17  ;;  %v103_v29 = vrot.slane %v94_v15, %v102_v26  ;;  %s301_s19 = sshll.u32 %s593_s2, 4  ;;  %s302_s19 = int_to_ptr.vmem [resolvable:$true] %s301_s19 }
  0x3b   :  { %433 = vmatpush3.bf16.msra.mxu1 %v432_v46  ;;  %s512_s20 = scalar_lea.vmem %s302_s19, 128  ;;  %p517_p3 = scmp.lt.s32.totalorder %s302_s19, %s302_s19 }
  0x3c   :  { %409 = vmatpush1.bf16.msra.mxu0 %v408_v44  ;;  %434 = vmatprep.subr.bf16.mxu1 %v590_v0  ;;  %p513_p2 = scmp.ne.s32.totalorder %s302_s19, %s512_s20  ;;  %p518_p4 = scmp.lt.s32.totalorder %s512_s20, %s512_s20 }
  0x3d   :  { %411 = vmatprep.subr.bf16.mxu0 %v410_v47 }
  0x3e   :  { %p519_p5 = por %p518_p4, %p517_p3 }
  0x3f   :  { %436 = vmatpush3.bf16.msra.mxu1 %v435_v55 }
  0x40   :  { %413 = vmatpush1.bf16.msra.mxu0 %v412_v53  ;;  %437 = vmatprep.subr.bf16.mxu1 %v590_v0  ;;  %p520_p6 = pnand %p519_p5, %p513_p2 }
  0x41   :  { %415 = vmatprep.subr.bf16.mxu0 %v414_v56 }
  0x43   :  { %439 = vmatpush3.bf16.msra.mxu1 %v438_v1 }
  0x44   :  { %417 = vmatpush1.bf16.msra.mxu0 %v416_v62  ;;  %440 = vmatprep.subr.bf16.mxu1 %v590_v0 }
  0x45   :  { %419 = vmatprep.subr.bf16.mxu0 %v418_v2 }
  0x47   :  { %442 = vmatpush3.bf16.msra.mxu1 %v441_v7 }
  0x48   :  { %421 = vmatpush1.bf16.msra.mxu0 %v420_v6  ;;  %443 = vmatprep.subr.bf16.mxu1 %v590_v0 }
  0x4b   :  { %176 = vmatmul.mubr.f32.vlgmr.msra.gmra.mrb[0].mxu0 %v45_v10  ;;  %445 = vmatpush3.bf16.msra.mxu1 %v444_v11 }
  0x4e   :  { %388 = vmatmul.mubr.f32.vlgmr.msra.gmra.mrb[0].mxu1 %v45_v10 }
 0x11e   :  { %v177_v18 = vpop.f32.mrb[0].mxu0 }
 0x11f   :  { %v178_v19 = vadd.f32 %v177_v18, %v99_v16  ;;  %v179_v20 = vpop.f32.mrb[1].mxu0 }
 0x120   :  { %v180_v30 = vadd.f32 %v179_v20, %v103_v29 }
 0x121   :  { %v252_v22 = vsub.f32 0.0, %v178_v19  ;;  %v248_v23 = vpop.f32.mrb[0].mxu1 }
 0x122   :  { %v249_v0 = vadd.f32 %v248_v23, %v107_v21  ;;  %v389_v25 = vpop.f32.mrb[1].mxu1 }
 0x123   :  { %v253_v24 = vmul.f32 1.442695, %v252_v22 }
 0x124   :  { %v259_v27 = vsub.f32 0.0, %v249_v0 }
 0x125   :  { %456 = vpow2.f32 %v253_v24 }
 0x126   :  { %v260_v28 = vmul.f32 1.442695, %v259_v27 }
 0x128   :  { %458 = vpow2.f32 %v260_v28 }
 0x129   :  { %460 = vtanh.f32 %v180_v30 }
 0x12f   :  { %v457_v31 = vpop.eup %456 }
 0x130   :  { %v255_v32 = vadd.f32 1.0, %v457_v31 }
 0x132   :  { %462 = vrcp.f32 %v255_v32  ;;  %v459_v33 = vpop.eup %458 }
 0x133   :  { %v262_v34 = vadd.f32 1.0, %v459_v33  ;;  %v461_v35 = vpop.eup %460 }
 0x135   :  { %464 = vrcp.f32 %v262_v34 }
 0x13c   :  { %v463_v36 = vpop.eup %462 }
 0x13d   :  { %v265_v37 = vmul.f32 %v463_v36, %v461_v35 }
 0x13f   :  { %466 = vtanh.f32 %v265_v37  ;;  %v465_v38 = vpop.eup %464 }
 0x149   :  { %v467_v39 = vpop.eup %466 }
 0x14a   :  { %v267_v40 = vmul.f32 %v467_v39, %v465_v38 }
 0x14c   :  { %v268_v41 = vmax.f32 %v267_v40, 0.0 }
 0x14e   :  { %269 = vst [vmem:[#allocation7] sm:$0xff] %v268_v41  ;;  %v277_v42 = vrot.slane %v268_v41, 4  ;;  %v286_v43 = vmul.f32 %v268_v41, %v268_v41 }
 0x14f   :  { %523 = shalt.err (!%p520_p6)
}
 0x150   :  { %s524_s23 = scalar_lea.hbm %s715_s3, 128 }
 0x151   :  { %p525_p7 = scmp.ne.s32.totalorder %s715_s3, %s524_s23  ;;  %p528_p8 = scmp.lt.u32.totalorder %s524_s23, %s715_s3 }
 0x153   :  { %p530_p9 = pnand %p528_p8, %p525_p7 }
 0x155   :  { %533 = shalt.err (!%p530_p9)
}
 0x156   :  { %304 = dma.vmem_to_hbm [thread:$0]  %s302_s19, 128, %s715_s3, [#allocation4]   ;;  %v278_v44 = vadd.f32 %v277_v42, %v268_v41  ;;  %v287_v45 = vrot.slane %v286_v43, 4  ;;  %v276_v52 = vld [vmem:[#allocation8] sm:$0x1] }
 0x157   :  { %s594_s30 = smov [#allocation8]   ;;  %v285_v55 = vld [vmem:[#allocation10] sm:$0x1]  ;;  %s595_s7 = smov [#allocation10]  }
 0x158   :  { %v279_v46 = vrot.slane %v278_v44, 2  ;;  %v288_v47 = vadd.f32 %v287_v45, %v286_v43  ;;  %s311_s6 = sshll.u32 %s594_s30, 4  ;;  %s321_s8 = sshll.u32 %s595_s7, 4  ;;  %s312_s6 = int_to_ptr.vmem [resolvable:$true] %s311_s6  ;;  %s680_s8 = int_to_ptr.vmem [resolvable:$true] %s321_s8 }
 0x159   :  { %s534_s3 = scalar_lea.vmem %s312_s6, 16  ;;  %s538_s9 = scalar_lea.vmem %s312_s6, 32 }
 0x15a   :  { %v280_v48 = vadd.f32 %v279_v46, %v278_v44  ;;  %v289_v49 = vrot.slane %v288_v47, 2  ;;  %p535_p10 = scmp.ne.s32.totalorder %s312_s6, %s534_s3  ;;  %p539_p11 = scmp.lt.s32.totalorder %s312_s6, %s312_s6 }
 0x15b   :  { %p540_p12 = scmp.lt.s32.totalorder %s538_s9, %s534_s3 }
 0x15c   :  { %v281_v50 = vrot.slane %v280_v48, 1  ;;  %v290_v51 = vadd.f32 %v289_v49, %v288_v47 }
 0x15d   :  { %p541_p13 = por %p540_p12, %p539_p11 }
 0x15e   :  { %v282_v53 = vadd.f32 %v281_v50, %v280_v48  ;;  %v291_v54 = vrot.slane %v290_v51, 1 }
 0x15f   :  { %p542_p0 = pnand %p541_p13, %p535_p10 }
 0x160   :  { %v283_v56 = vadd.f32 %v282_v53, %v276_v52  ;;  %v292_v57 = vadd.f32 %v291_v54, %v290_v51 }
 0x162   :  { %284 = vst [vmem:[#allocation8] sm:$0x1] %v283_v56  ;;  %v293_v58 = vadd.f32 %v292_v57, %v285_v55 }
 0x163   :  { %545 = shalt.err (!%p542_p0)
}
 0x164   :  { %s546_s12 = scalar_lea.hbm %s716_s4, 16 }
 0x165   :  { %p547_p1 = scmp.ne.s32.totalorder %s716_s4, %s546_s12  ;;  %p550_p2 = scmp.lt.u32.totalorder %s546_s12, %s716_s4 }
 0x167   :  { %p552_p3 = pnand %p550_p2, %p547_p1 }
 0x169   :  { %555 = shalt.err (!%p552_p3)
}
 0x16a   :  { %314 = dma.vmem_to_hbm [thread:$0]  %s312_s6, 16, %s716_s4, [#allocation9]   ;;  %294 = vst [vmem:[#allocation10] sm:$0x1] %v293_v58 }
 0x16b   :  { %s556_s1 = scalar_lea.vmem %s680_s8, 16  ;;  %s560_s18 = scalar_lea.vmem %s680_s8, 32 }
 0x16c   :  { %p557_p4 = scmp.ne.s32.totalorder %s680_s8, %s556_s1  ;;  %p561_p5 = scmp.lt.s32.totalorder %s680_s8, %s680_s8 }
 0x16d   :  { %p562_p6 = scmp.lt.s32.totalorder %s560_s18, %s556_s1 }
 0x16f   :  { %p563_p7 = por %p562_p6, %p561_p5 }
 0x171   :  { %p564_p8 = pnand %p563_p7, %p557_p4 }
 0x173   :  { %567 = shalt.err (!%p564_p8)
}
 0x174   :  { %s568_s20 = scalar_lea.hbm %s717_s5, 16 }
 0x175   :  { %p569_p9 = scmp.ne.s32.totalorder %s717_s5, %s568_s20  ;;  %p572_p10 = scmp.lt.u32.totalorder %s568_s20, %s717_s5 }
 0x177   :  { %p574_p11 = pnand %p572_p10, %p569_p9 }
 0x179   :  { %577 = shalt.err (!%p574_p11)
}
 0x17a   :  { %324 = dma.vmem_to_hbm [thread:$0]  %s680_s8, 16, %s717_s5, [#allocation9]  }
 0x17b   :  { %582 = dma.done.wait [#allocation4], 128  }
 0x17c   :  { %583 = vsyncadd [#allocation4], 4294967168 }
 0x17d   :  { %584 = dma.done.wait [#allocation9], 32  }
 0x17e   :  { %585 = vsyncadd [#allocation9], 4294967264 }
 0x17f   :  { %334 = vsyncpa [#allocation3], 1 }
 0x180   :  { %335 = vsyncpa [#allocation6], 1 }
 0x181   :  { %336 = vsyncpa [#allocation4], 1 }
 0x182   :  { %337 = vsyncpa [#allocation9], 1 }

</bundles_post_ra>
